<compile_context>
chip_gen: v7x
topology: tpu7x:2x2x1
jax: 0.10.0
libtpu: 0.0.40
codegen_flags: <defaults>
</compile_context>

<pallas_src>
import functools

import jax
import jax.numpy as jnp
from jax import lax
from jax.experimental import pallas as pl
from jax.experimental.pallas import tpu as pltpu

HIDDEN = 1792      # fixed by the PyTorch module (nn.Embedding(2, 1792), LayerNorm(1792))
N_TAGS = 2
LN_EPS = 1e-5      # PyTorch LayerNorm default


def _query_embedding_kernel(tags_ref, x_ref, const_ref, o_ref):
    # tags_ref : (TM, 1)  float32 (values 0.0 or 1.0)
    # x_ref    : (TM, H)  input dtype (f32 or bf16)
    # const_ref: (8,  H)  float32; rows: 0=table[0], 1=table[1]-table[0],
    #                               2=LN weight, 3=LN bias, 4-7 unused
    # o_ref    : (TM, H)  output dtype
    x = x_ref[...].astype(jnp.float32)                     # (TM, H)
    t = tags_ref[...]                                      # (TM, 1) f32

    emb0 = const_ref[0:1, :]                               # (1, H)
    delta = const_ref[1:2, :]
    gamma = const_ref[2:3, :]
    beta = const_ref[3:4, :]

    # Embedding "lookup" as one broadcasted FMA (only 2 rows in the table).
    y = x + emb0 + t * delta                               # x += query_embeddings

    # Two-pass LayerNorm (biased variance), matches PyTorch numerics.
    inv_h = jnp.float32(1.0 / HIDDEN)
    mean = jnp.sum(y, axis=-1, keepdims=True) * inv_h      # (TM, 1)
    yc = y - mean
    var = jnp.sum(yc * yc, axis=-1, keepdims=True) * inv_h
    inv = lax.rsqrt(var + jnp.float32(LN_EPS))

    o_ref[...] = (yc * inv * gamma + beta).astype(o_ref.dtype)


def _round_up(n, m):
    return ((n + m - 1) // m) * m


def _tpu_vmem_capacity_bytes():
    try:
        return int(pltpu.get_tpu_info().vmem_capacity_bytes)
    except Exception:
        return 64 << 20          # conservative (v7x-sized) fallback


@functools.partial(jax.jit, static_argnames=("tile_rows", "vmem_limit"))
def _query_embedding_call(tags2, x2, consts, *, tile_rows, vmem_limit):
    N, H = x2.shape
    grid = (pl.cdiv(N, tile_rows),)   # boundary block masked by Pallas (no pad/slice)
    return pl.pallas_call(
        _query_embedding_kernel,
        out_shape=jax.ShapeDtypeStruct((N, H), x2.dtype),
        grid_spec=pltpu.PrefetchScalarGridSpec(
            num_scalar_prefetch=0,
            grid=grid,
            in_specs=[
                pl.BlockSpec((tile_rows, 1), lambda i: (i, 0)),   # tags (f32)
                pl.BlockSpec((tile_rows, H), lambda i: (i, 0)),   # x
                pl.BlockSpec((8, H), lambda i: (0, 0)),           # packed constants
            ],
            out_specs=pl.BlockSpec((tile_rows, H), lambda i: (i, 0)),
        ),
        compiler_params=pltpu.CompilerParams(
            dimension_semantics=("parallel",),
            vmem_limit_bytes=vmem_limit,
        ),
    )(tags2, x2, consts)


def query_embedding_forward(x, tags, table, gamma, beta, *, tile_rows=None):
    """x: (B, S, H) f32/bf16, tags: (B, S) int.  Returns (B, S, H) in x.dtype."""
    B, S, H = x.shape
    assert H == HIDDEN
    N = B * S

    vmem_cap = _tpu_vmem_capacity_bytes()
    if tile_rows is None:
        # 1024-row tiles on 128 MiB-VMEM chips (v5e/v6e); 512 on 64 MiB (v7x).
        tile_rows = 1024 if vmem_cap >= (96 << 20) else 512

    # Ensure >= 2 grid steps (dual-TC v7x sharding via "parallel") whenever
    # possible, and never tile beyond what the input needs.
    tr = max(8, min(_round_up(tile_rows, 8), _round_up(pl.cdiv(N, 2), 8)))

    x2 = x.reshape(N, H)
    tags2 = tags.reshape(N, 1).astype(jnp.float32)

    # Pack emb0 / delta / gamma / beta into one (8, H) f32 constant block.
    table_f32 = table.astype(jnp.float32)
    consts = jnp.zeros((8, H), jnp.float32)
    consts = consts.at[0].set(table_f32[0])
    consts = consts.at[1].set(table_f32[1] - table_f32[0])
    consts = consts.at[2].set(gamma.reshape(H).astype(jnp.float32))
    consts = consts.at[3].set(beta.reshape(H).astype(jnp.float32))

    # VMEM budget: double-buffered x + out tiles, f32 compute temporaries,
    # tiny tags blocks, packed constants, plus headroom for Mosaic scratch.
    io_block = tr * H * x.dtype.itemsize
    need = 2 * 2 * io_block            # double-buffered x + out
    need += 2 * tr * H * 4             # f32 compute temporaries
    need += 2 * tr * 4                 # tags blocks
    need += 2 * 8 * H * 4              # packed constants
    need += 8 << 20                    # headroom
    # Never request more than ~75% of physical VMEM (leaves room on v7x).
    vmem_limit = int(min(max(need, 32 << 20), int(0.75 * vmem_cap)))

    out = _query_embedding_call(tags2, x2, consts,
                                tile_rows=tr, vmem_limit=vmem_limit)
    return out.reshape(B, S, H)


def _reference(x, tags, table, gamma, beta):
    emb = table[tags]                     # (B, S, H)
    y = x.astype(jnp.float32) + emb
    mean = jnp.mean(y, axis=-1, keepdims=True)
    var = jnp.mean((y - mean) ** 2, axis=-1, keepdims=True)
    normed = (y - mean) * lax.rsqrt(var + LN_EPS)
    return normed * gamma + beta


if __name__ == "__main__":
    key = jax.random.PRNGKey(0)
    k_x, k_tags, k_emb, k_x2, k_tags2, k_x3, k_tags3 = jax.random.split(key, 7)

    H = HIDDEN
    # Deterministic parameter init (matches nn.Module shapes):
    table = jax.random.normal(k_emb, (N_TAGS, H), dtype=jnp.float32)  # nn.Embedding(2, 1792)
    gamma = jnp.ones((H,), dtype=jnp.float32)                         # LayerNorm weight
    beta = jnp.zeros((H,), dtype=jnp.float32)                         # LayerNorm bias

    # Case 1: B*S a multiple of 8 (f32 I/O).
    B, S = 2, 8
    x = jax.random.normal(k_x, (B, S, H), dtype=jnp.float32)
    tags = jax.random.randint(k_tags, (B, S), 0, N_TAGS, dtype=jnp.int32)
    out = jax.block_until_ready(query_embedding_forward(x, tags, table, gamma, beta))
    ref = _reference(x, tags, table, gamma, beta)
    assert out.shape == (B, S, H)
    assert jnp.allclose(out, ref.astype(out.dtype), atol=1e-4, rtol=1e-4)

    # Case 2: ragged B*S (exercises the masked boundary block, no pad/slice).
    B2, S2 = 3, 5
    x2 = jax.random.normal(k_x2, (B2, S2, H), dtype=jnp.float32)
    tags2 = jax.random.randint(k_tags2, (B2, S2), 0, N_TAGS, dtype=jnp.int32)
    out2 = jax.block_until_ready(query_embedding_forward(x2, tags2, table, gamma, beta))
    ref2 = _reference(x2, tags2, table, gamma, beta)
    assert out2.shape == (B2, S2, H)
    assert jnp.allclose(out2, ref2.astype(out2.dtype), atol=1e-4, rtol=1e-4)

    # Case 3: bf16 I/O path (~2x HBM bandwidth); params / math stay f32.
    B3, S3 = 2, 7
    x3 = jax.random.normal(k_x3, (B3, S3, H), dtype=jnp.float32).astype(jnp.bfloat16)
    tags3 = jax.random.randint(k_tags3, (B3, S3), 0, N_TAGS, dtype=jnp.int32)
    out3 = jax.block_until_ready(query_embedding_forward(x3, tags3, table, gamma, beta))
    ref3 = _reference(x3, tags3, table, gamma, beta)
    assert out3.dtype == jnp.bfloat16 and out3.shape == (B3, S3, H)
    assert jnp.allclose(out3.astype(jnp.float32), ref3, atol=5e-2, rtol=5e-2)

    # TODO(synk): the remaining CrossEncoder graph (HF backbone, TransformerEncoder,
    # ragged split/pad bookkeeping, linear heads, sigmoid) is left to XLA, not Pallas.
    print("KERNEL_OK")
</pallas_src>

<mosaic_0001>
module attributes {stable_mosaic.version = 11 : i64} {
  func.func @_query_embedding_kernel(%arg0: i32, %arg1: memref<8x1xf32, #tpu.memory_space<vmem>>, %arg2: memref<8x1792xf32, #tpu.memory_space<vmem>>, %arg3: memref<8x1792xf32, #tpu.memory_space<vmem>>, %arg4: memref<8x1792xf32, #tpu.memory_space<vmem>>) attributes {dimension_semantics = [#tpu.dimension_semantics<parallel>], iteration_bounds = array<i64: 2>, scalar_prefetch = 0 : i64, scratch_operands = 0 : i64, tpu.core_type = #tpu.core_type<tc>, window_params = [{transform_indices = @transform_0, window_bounds = array<i64: 8, 1>}, {transform_indices = @transform_1, window_bounds = array<i64: 8, 1792>}, {pipeline_mode = #tpu.pipeline_mode<synchronous>, transform_indices = @transform_2, window_bounds = array<i64: 8, 1792>}, {transform_indices = @transform_3, window_bounds = array<i64: 8, 1792>}]} {
    %c0 = arith.constant 0 : index
    %c0_0 = arith.constant 0 : index
    %0 = vector.load %arg2[%c0, %c0_0] : memref<8x1792xf32, #tpu.memory_space<vmem>>, vector<8x1792xf32>
    %c0_1 = arith.constant 0 : index
    %c0_2 = arith.constant 0 : index
    %1 = vector.load %arg1[%c0_1, %c0_2] : memref<8x1xf32, #tpu.memory_space<vmem>>, vector<8x1xf32>
    %c0_3 = arith.constant 0 : index
    %c0_4 = arith.constant 0 : index
    %2 = vector.load %arg3[%c0_3, %c0_4] : memref<8x1792xf32, #tpu.memory_space<vmem>>, vector<1x1792xf32>
    %c1 = arith.constant 1 : index
    %c0_5 = arith.constant 0 : index
    %3 = vector.load %arg3[%c1, %c0_5] : memref<8x1792xf32, #tpu.memory_space<vmem>>, vector<1x1792xf32>
    %c2 = arith.constant 2 : index
    %c0_6 = arith.constant 0 : index
    %4 = vector.load %arg3[%c2, %c0_6] : memref<8x1792xf32, #tpu.memory_space<vmem>>, vector<1x1792xf32>
    %c3 = arith.constant 3 : index
    %c0_7 = arith.constant 0 : index
    %5 = vector.load %arg3[%c3, %c0_7] : memref<8x1792xf32, #tpu.memory_space<vmem>>, vector<1x1792xf32>
    %6 = vector.broadcast %2 : vector<1x1792xf32> to vector<8x1792xf32>
    %7 = arith.addf %0, %6 : vector<8x1792xf32>
    %8 = vector.broadcast %1 : vector<8x1xf32> to vector<8x1792xf32>
    %9 = vector.broadcast %3 : vector<1x1792xf32> to vector<8x1792xf32>
    %10 = arith.mulf %8, %9 : vector<8x1792xf32>
    %11 = arith.addf %7, %10 : vector<8x1792xf32>
    %cst = arith.constant dense<0.000000e+00> : vector<8xf32>
    %12 = vector.multi_reduction <add>, %11, %cst [1] : vector<8x1792xf32> to vector<8xf32>
    %13 = vector.shape_cast %12 : vector<8xf32> to vector<8x1xf32>
    %cst_8 = arith.constant 5.58035739E-4 : f32
    %14 = vector.broadcast %cst_8 : f32 to vector<8x1xf32>
    %15 = arith.mulf %13, %14 : vector<8x1xf32>
    %16 = vector.broadcast %15 : vector<8x1xf32> to vector<8x1792xf32>
    %17 = arith.subf %11, %16 : vector<8x1792xf32>
    %18 = arith.mulf %17, %17 : vector<8x1792xf32>
    %cst_9 = arith.constant dense<0.000000e+00> : vector<8xf32>
    %19 = vector.multi_reduction <add>, %18, %cst_9 [1] : vector<8x1792xf32> to vector<8xf32>
    %20 = vector.shape_cast %19 : vector<8xf32> to vector<8x1xf32>
    %cst_10 = arith.constant 5.58035739E-4 : f32
    %21 = vector.broadcast %cst_10 : f32 to vector<8x1xf32>
    %22 = arith.mulf %20, %21 : vector<8x1xf32>
    %cst_11 = arith.constant 9.99999974E-6 : f32
    %23 = vector.broadcast %cst_11 : f32 to vector<8x1xf32>
    %24 = arith.addf %22, %23 : vector<8x1xf32>
    %25 = math.rsqrt %24 : vector<8x1xf32>
    %26 = vector.broadcast %25 : vector<8x1xf32> to vector<8x1792xf32>
    %27 = arith.mulf %17, %26 : vector<8x1792xf32>
    %28 = vector.broadcast %4 : vector<1x1792xf32> to vector<8x1792xf32>
    %29 = arith.mulf %27, %28 : vector<8x1792xf32>
    %30 = vector.broadcast %5 : vector<1x1792xf32> to vector<8x1792xf32>
    %31 = arith.addf %29, %30 : vector<8x1792xf32>
    %c0_12 = arith.constant 0 : index
    %c0_13 = arith.constant 0 : index
    %32 = vector.load %arg4[%c0_12, %c0_13] : memref<8x1792xf32, #tpu.memory_space<vmem>>, vector<8x1792xf32>
    tpu.vector_store %arg4[%c0_12, %c0_13], %31 {strides = array<i32>} : memref<8x1792xf32, #tpu.memory_space<vmem>>, vector<8x1792xf32>,
    return
  }
  func.func @transform_0(%arg0: i32) -> (i32, i32) {
    %c0_i32 = arith.constant 0 : i32
    %c0_i32_0 = arith.constant 0 : i32
    return %arg0, %c0_i32 : i32, i32
  }
  func.func @transform_1(%arg0: i32) -> (i32, i32) {
    %c0_i32 = arith.constant 0 : i32
    %c0_i32_0 = arith.constant 0 : i32
    return %arg0, %c0_i32 : i32, i32
  }
  func.func @transform_2(%arg0: i32) -> (i32, i32) {
    %c0_i32 = arith.constant 0 : i32
    %c0_i32_0 = arith.constant 0 : i32
    %c0_i32_1 = arith.constant 0 : i32
    return %c0_i32, %c0_i32_0 : i32, i32
  }
  func.func @transform_3(%arg0: i32) -> (i32, i32) {
    %c0_i32 = arith.constant 0 : i32
    %c0_i32_0 = arith.constant 0 : i32
    return %arg0, %c0_i32 : i32, i32
  }
}

</mosaic_0001>

<bundles_post_ra>
// kernel: _query_embedding_call.1
= control target key start
LH: loop header
LB: loop body
LE: loop exit
PB: predicated region body
PF: predicated region fallthrough
CT: control target
= control target key end

     0   :  { %8 = vsyncpa [#allocation3], 0  ;;  %s1507_s0 = inlined_call_operand.vmem [shape: f32[16,1], index: 0, kind: input, shape index: {}]   ;;  %s1508_s1 = inlined_call_operand.hbm [shape: f32[16,1792], index: 1, kind: input, shape index: {}]   ;;  %s1509_s2 = inlined_call_operand.hbm [shape: f32[8,1792], index: 2, kind: input, shape index: {}]   ;;  %s1510_s3 = inlined_call_operand.hbm [shape: f32[16,1792], index: 3, kind: output, shape index: {}]  }
   0x1   :  { %10 = vsyncpa [#allocation3 + $0x1], 0 }
   0x2   :  { %11 = vsyncpa [#allocation6], 0 }
   0x3   :  { %12 = vsyncpa [#allocation4], 0 }
   0x4   :  { %14 = vsyncpa [#allocation4 + $0x1], 0  ;;  %s1053_s12 = smov 0   ;;  %s1055_s13 = smov 0  }
   0x5   :  { %s1057_s14 = smov 0   ;;  %s1059_s15 = smov 0  }
   0x6 LB: > { %s1074_s16 = sadd.s32 4294967295, %s1027_s15   ;;  %s823_s17 = sadd.s32 4294967294, %s1027_s15   ;;  %s1027_s15 = sphi %s1059_s15, %s1534_s15   ;;  %s1023_s14 = sphi %s1057_s14, %s1533_s14   ;;  %s1019_s13 = sphi %s1055_s13, %s1532_s13   ;;  %s1015_s12 = sphi %s1053_s12, %s1531_s12  }
   0x7   : > { %p66_p0 = scmp.ne.s32.totalorder %s1019_s13, %s1015_s12  ;;  %p1511_p1 = scmp.eq.s32.totalorder %s1074_s16, 0 }
   0x8   : > { %p117_p3 = scmp.eq.s32.totalorder %s823_s17, 1  ;;  %p824_p5 = scmp.ge.s32.totalorder %s1027_s15, 1 }
   0x9   : > { %p1083_p4 = por %p1511_p1, %p66_p0  ;;  %p124_p7 = scmp.lt.s32.totalorder %s1027_s15, 3 }
   0xa   : > { %p1088_p6 = por %p117_p3, %p66_p0  ;;  %s1029_s21 = smov [#allocation5]  }
   0xb   : > { %s1514_s18 = scalar_select %p1083_p4, 1, 0 }
   0xc   : > { %s1515_s19 = scalar_select %p1088_p6, 1, 0 }
   0xd   : > { %p1093_p8 = pnand %p824_p5, %p124_p7  ;;  %s137_s22 = sshll.u32 %s1029_s21, 4  ;;  %s138_s22 = int_to_ptr.vmem [resolvable:$true] %s137_s22 }
   0xe   : > { %s1101_s23 = sadd.s32 1, %s1027_s15   ;;  %s53_s27 = sadd.s32 1, %s1023_s14 }
   0xf   : > { %s1516_s20 = scalar_select %p1093_p8, 1, 0 }
  0x10   : > { %p846_p10 = pneg %p1093_p8  ;;  %s50_s25 = ssub.s32 %s1027_s15, %s1101_s23 }
  0x11   : > { %p1111_p12 = scmp.eq.s32.totalorder %s50_s25, 0  ;;  %s899_s30 = scalar_lea.hbm %s1509_s2, 1792 }
  0x12   : > { %p1105_p11 = pnand %p846_p10, %p1511_p1  ;;  %p900_p0 = scmp.ne.s32.totalorder %s1509_s2, %s899_s30 }
  0x13   : > { %s1518_s26 = scalar_select %p1111_p12, 1, 0 }
  0x14   : > { %p901_p3 = pneg %p1105_p11  ;;  %p906_p10 = scmp.lt.u32.totalorder %s899_s30, %s1509_s2 }
  0x16   : > { %p902_p5 = pnand %p901_p3, %p900_p0 }
  0x18   : > { %p903_p7 = pneg %p902_p5 }
  0x1a   : > { %p908_p9 = pnand %p906_p10, %p903_p7 }
  0x1c   : > { %911 = shalt.err (!%p908_p9)
}
  0x1d   : > { %s912_s8 = scalar_lea.vmem %s138_s22, 1792  ;;  %p920_p6 = scmp.lt.s32.totalorder %s138_s22, %s138_s22 }
  0x1e   : > { %p913_p1 = scmp.ne.s32.totalorder %s138_s22, %s912_s8  ;;  %p921_p4 = scmp.lt.s32.totalorder %s912_s8, %s912_s8 }
  0x20   : > { %p915_p2 = pnand %p913_p1, %p901_p3  ;;  %p922_p8 = por %p921_p4, %p920_p6 }
  0x22   : > { %p916_p13 = pneg %p915_p2 }
  0x24   : > { %p923_p12 = pnand %p922_p8, %p916_p13 }
  0x26   : > { %926 = shalt.err (!%p923_p12)
}
  0x27   : > { %849 = dma.hbm_to_vmem [thread:$0]  (!%p1105_p11), %s1509_s2, 1792, %s138_s22, [#allocation6]  }
  0x28   : > { %p1519_p1 = scmp.ne.s32.totalorder %s1518_s26, 0  ;;  %p61_p2 = scmp.eq.s32.totalorder %s1027_s15, 0 }
  0x29   : > { %p1520_p4 = scmp.ne.s32.totalorder %s1023_s14, %s1019_s13  ;;  %p1521_p6 = scmp.eq.s32.totalorder %s1074_s16, 1 }
  0x2a   : > { %s1137_s11 = scalar_select %p1519_p1, %s1023_s14, %s53_s27  }
  0x2b   : > { %p1145_p8 = por %p1521_p6, %p1520_p4  ;;  %p859_p9 = scmp.lt.s32.totalorder %s1027_s15, 2 }
  0x2c   : > { %s155_s21 = sand.u32 1, %s1023_s14   ;;  %p1523_p12 = pmov %p1520_p4 }
  0x2d   : > { %s834_s24 = smul.u32 112, %s155_s21  ;;  %s156_s4 = scalar_lea.sflag [#allocation3], %s155_s21 }
  0x2e   : > { %p62_p13 = por %p61_p2, %p1523_p12  ;;  %s835_s25 = smul.u32 1792, %s1027_s15 }
  0x2f   : > { %s159_s29 = scalar_lea.vmem [#allocation2], %s834_s24  ;;  %s932_s8 = scalar_lea.hbm %s1508_s1, 3584 }
  0x30   : > { %p1155_p0 = pnand %p859_p9, %p62_p13  ;;  %s1162_s27 = scalar_lea.hbm %s1508_s1, %s835_s25 }
  0x31   : > { %s167_s30 = sshll.u32 %s159_s29, 4  ;;  %s927_s5 = scalar_lea.hbm %s1162_s27, 1792  ;;  %s1164_s30 = int_to_ptr.vmem [resolvable:$true] %s167_s30 }
  0x32   : > { %p928_p11 = scmp.ne.s32.totalorder %s1162_s27, %s927_s5  ;;  %p929_p3 = pneg %p1155_p0 }
  0x33   : > { %p933_p10 = scmp.lt.u32.totalorder %s1162_s27, %s1508_s1  ;;  %p934_p1 = scmp.lt.u32.totalorder %s932_s8, %s927_s5 }
  0x34   : > { %p930_p5 = pnand %p929_p3, %p928_p11  ;;  %p936_p4 = scmp.lt.u32.totalorder %s927_s5, %s1162_s27 }
  0x35   : > { %p935_p2 = por %p934_p1, %p933_p10 }
  0x36   : > { %p931_p7 = pneg %p930_p5 }
  0x37   : > { %p937_p6 = por %p936_p4, %p935_p2 }
  0x39   : > { %p938_p9 = pnand %p937_p6, %p931_p7 }
  0x3b   : > { %941 = shalt.err (!%p938_p9)
}
  0x3c   : > { %s942_s21 = scalar_lea.vmem %s1164_s30, 1792  ;;  %s1030_s24 = smov [#allocation2]  }
  0x3d   : > { %p943_p12 = scmp.ne.s32.totalorder %s1164_s30, %s942_s21  ;;  %s947_s25 = sshll.u32 %s1030_s24, 4  ;;  %s948_s25 = int_to_ptr.vmem [resolvable:$false] %s947_s25 }
  0x3e   : > { %s949_s22 = scalar_lea.vmem %s948_s25, 3584  ;;  %p950_p5 = scmp.lt.s32.totalorder %s1164_s30, %s948_s25 }
  0x3f   : > { %p945_p13 = pnand %p943_p12, %p929_p3  ;;  %p951_p10 = scmp.lt.s32.totalorder %s949_s22, %s942_s21 }
  0x41   : > { %p946_p11 = pneg %p945_p13  ;;  %p952_p1 = por %p951_p10, %p950_p5 }
  0x43   : > { %p953_p2 = pnand %p952_p1, %p946_p11 }
  0x45   : > { %956 = shalt.err (!%p953_p2)
}
  0x46   : > { %853 = dma.hbm_to_vmem [thread:$0]  (!%p1155_p0), %s1162_s27, 1792, %s1164_s30, %s156_s4  }
  0x47   : > { %p1525_p7 = scmp.ne.s32.totalorder %s1516_s20, 0 }
  0x48   : > { %s1194_s26 = sand.u32 (!%p1525_p7), 1, %s1019_s13   ;;  %p1526_p3 = scmp.ne.s32.totalorder (!%p1525_p7), %s1514_s18, 0 }
  0x49   : > { %176 = sbr.rel (%p1525_p7) target bundleno = 610 (0x262), region = 32  ;;  %s179_s5 = scalar_lea.sflag (!%p1525_p7), [#allocation3], %s1194_s26 }
  0x4a   : > { %s836_s29 = smul.u32 (!%p1525_p7), 112, %s1194_s26 }
  0x4c   : > { %s1200_s6 = scalar_lea.vmem (!%p1525_p7), [#allocation2], %s836_s29 }
  0x50   : > { %1002 = dma.done.wait (%p1526_p3), %s179_s5, 1792  }
  0x51   : > { %1004 = vsyncadd (%p1526_p3), %s179_s5, 4294965504  ;;  %p1527_p0 = scmp.eq.s32.totalorder %s1074_s16, 0 }
  0x53   : > { %1006 = dma.done.wait (%p1527_p0), [#allocation6], 1792   ;;  %p1528_p4 = pmov %p1527_p0 }
  0x54   : > { %p213_p6 = scmp.lt.s32.totalorder %s1074_s16, 1  ;;  %v1031_v0 = vmov 0   ;;  %v265_v2 = vlaneseq  ;;  %v232_v4 = vld [vmem:[#allocation5] ss:$8 sm:$0xf]  ;;  %s837_s18 = smul.u32 1792, %s1074_s16 }
  0x55   : > { %1008 = vsyncadd (%p1528_p4), [#allocation6], 4294965504  ;;  %896 = vset.pattern.permute.xlu0 %v1031_v0  ;;  %v233_v5 = vld [vmem:[#allocation5] ss:$8 sm:$0xf0]  ;;  %s212_s7 = scalar_lea.vmem [#allocation7], %s836_s29 }
  0x56   : > { %s214_s20 = scalar_select %p213_p6, %s1074_s16, 1  ;;  %v266_v3 = vshrl.u32 %v265_v2, 7  ;;  %v240_v6 = vld [vmem:[#allocation5 + $0x1] ss:$8 sm:$0xf]  ;;  %v1215_v8 = vor.u32 %v233_v5, %v232_v4 }
  0x57   : > { %v241_v7 = vld [vmem:[#allocation5 + $0x1] ss:$8 sm:$0xf0]  ;;  %v236_v35 = vld [vmem:[#allocation5 + $0x40] ss:$8 sm:$0xf]  ;;  %s1463_s10 = scalar_lea.hbm %s1510_s3, %s837_s18 }
  0x58   : > { %s830_s28 = sshll.u32 %s214_s20, 3  ;;  %v1217_v9 = vsub.s32 0, %v266_v3  ;;  %v1219_v10 = vsub.s32 1, %v266_v3  ;;  %v1221_v11 = vor.u32 %v241_v7, %v240_v6  ;;  %v1223_v12 = vsub.s32 2, %v266_v3  ;;  %v217_v15 = vld [vmem:[%s1200_s6] sm:$0xff]  ;;  %v218_v16 = vld [vmem:[%s1200_s6 + $0x8] sm:$0xff] }
  0x59   : > { %s216_s4 = scalar_lea.vmem %s1507_s0, %s830_s28  ;;  %v1235_v19 = vsub.s32 3, %v266_v3  ;;  %v1239_v21 = vsub.s32 4, %v266_v3  ;;  %v219_v23 = vld [vmem:[%s1200_s6 + $0x10] sm:$0xff]  ;;  %v1246_v27 = vsub.s32 5, %v266_v3  ;;  %v220_v30 = vld [vmem:[%s1200_s6 + $0x18] sm:$0xff]  ;;  %v221_v31 = vld [vmem:[%s1200_s6 + $0x20] sm:$0xff] }
  0x5a   : > { %v231_v1 = vld [vmem:[%s216_s4] sm:$0xff]  ;;  %v268_v13 = vrot.slane %v1215_v8, %v1217_v9  ;;  %v272_v14 = vrot.slane %v1215_v8, %v1219_v10  ;;  %v359_v17 = vrot.slane %v1221_v11, %v1217_v9  ;;  %v363_v18 = vrot.slane %v1221_v11, %v1219_v10  ;;  %v237_v36 = vld [vmem:[#allocation5 + $0x40] ss:$8 sm:$0x30]  ;;  %s731_s8 = sshll.u32 %s212_s7, 4  ;;  %s717_s21 = scalar_lea.sflag [#allocation4], %s1194_s26  ;;  %s1465_s8 = int_to_ptr.vmem [resolvable:$true] %s731_s8 }
  0x5b   : > { %351 = vperm.xlu0 %896, %v231_v1   ;;  %v276_v20 = vrot.slane %v1215_v8, %v1223_v12  ;;  %v367_v26 = vrot.slane %v1221_v11, %v1223_v12  ;;  %v280_v32 = vrot.slane %v1215_v8, %v1235_v19  ;;  %v1254_v33 = vsub.s32 6, %v266_v3  ;;  %v244_v39 = vld [vmem:[#allocation5 + $0x41] ss:$8 sm:$0xf]  ;;  %s957_s24 = scalar_lea.vmem %s1465_s8, 1792  ;;  %s1032_s25 = smov [#allocation7]  }
  0x5c   : > { %v335_v24 = vadd.f32 %v268_v13, %v217_v15  ;;  %v336_v25 = vadd.f32 %v272_v14, %v218_v16  ;;  %v371_v34 = vrot.slane %v1221_v11, %v1235_v19  ;;  %v284_v37 = vrot.slane %v1215_v8, %v1239_v21  ;;  %v245_v40 = vld [vmem:[#allocation5 + $0x41] ss:$8 sm:$0x30]  ;;  %p958_p9 = scmp.ne.s32.totalorder %s1465_s8, %s957_s24  ;;  %s961_s22 = sshll.u32 %s1032_s25, 4  ;;  %s962_s22 = int_to_ptr.vmem [resolvable:$false] %s961_s22 }
  0x5d   : > { %v337_v38 = vadd.f32 %v276_v20, %v219_v23  ;;  %v375_v41 = vrot.slane %v1221_v11, %v1239_v21  ;;  %v288_v45 = vrot.slane %v1215_v8, %v1246_v27  ;;  %v1269_v46 = vsub.s32 7, %v266_v3  ;;  %v222_v47 = vld [vmem:[%s1200_s6 + $0x28] sm:$0xff]  ;;  %v223_v55 = vld [vmem:[%s1200_s6 + $0x30] sm:$0xff]  ;;  %v224_v62 = vld [vmem:[%s1200_s6 + $0x38] sm:$0xff]  ;;  %s963_s29 = scalar_lea.vmem %s962_s22, 3584  ;;  %p964_p11 = scmp.lt.s32.totalorder %s1465_s8, %s962_s22 }
  0x5e   : > { %v338_v48 = vadd.f32 %v280_v32, %v220_v30  ;;  %v379_v49 = vrot.slane %v1221_v11, %v1246_v27  ;;  %v1275_v51 = vor.u32 %v237_v36, %v236_v35  ;;  %v1277_v52 = vor.u32 %v245_v40, %v244_v39  ;;  %v225_v5 = vld [vmem:[%s1200_s6 + $0x40] sm:$0xff]  ;;  %v226_v15 = vld [vmem:[%s1200_s6 + $0x48] sm:$0xff]  ;;  %p959_p12 = pnand %p958_p9, %p1145_p8  ;;  %p965_p5 = scmp.lt.s32.totalorder %s963_s29, %s957_s24 }
  0x5f   : > { %v292_v53 = vrot.slane %v1215_v8, %v1254_v33  ;;  %v339_v54 = vadd.f32 %v284_v37, %v221_v31  ;;  %v383_v56 = vrot.slane %v1221_v11, %v1254_v33  ;;  %v296_v60 = vrot.slane %v1215_v8, %v1269_v46 }
  0x60   : > { %v340_v61 = vadd.f32 %v288_v45, %v222_v47  ;;  %v387_v63 = vrot.slane %v1221_v11, %v1269_v46  ;;  %v300_v3 = vrot.slane %v1275_v51, %v1217_v9  ;;  %v391_v6 = vrot.slane %v1277_v52, %v1217_v9  ;;  %p960_p13 = pneg %p959_p12  ;;  %p966_p10 = por %p965_p5, %p964_p11 }
  0x61   : > { %v341_v4 = vadd.f32 %v292_v53, %v223_v55  ;;  %v304_v13 = vrot.slane %v1275_v51, %v1219_v10  ;;  %v342_v14 = vadd.f32 %v296_v60, %v224_v62  ;;  %v395_v16 = vrot.slane %v1277_v52, %v1219_v10 }
  0x62   : > { %v308_v23 = vrot.slane %v1275_v51, %v1223_v12  ;;  %v312_v31 = vrot.slane %v1275_v51, %v1235_v19  ;;  %v403_v35 = vrot.slane %v1277_v52, %v1235_v19  ;;  %v316_v39 = vrot.slane %v1275_v51, %v1239_v21  ;;  %p967_p1 = pnand %p966_p10, %p960_p13 }
  0x63   : > { %v344_v32 = vadd.f32 %v304_v13, %v226_v15  ;;  %v411_v53 = vrot.slane %v1277_v52, %v1246_v27 }
  0xda   : > { %v1241_v22 = vpop.permute.xlu0 %351 }
  0xdb   : > { %v426_v28 = vmul.f32 %v359_v17, %v1241_v22  ;;  %v427_v29 = vmul.f32 %v363_v18, %v1241_v22  ;;  %v428_v42 = vmul.f32 %v367_v26, %v1241_v22  ;;  %v429_v50 = vmul.f32 %v371_v34, %v1241_v22  ;;  %v228_v34 = vld [vmem:[%s1200_s6 + $0x58] sm:$0xff] }
  0xdc   : > { %v430_v57 = vmul.f32 %v375_v41, %v1241_v22  ;;  %v431_v0 = vmul.f32 %v379_v49, %v1241_v22  ;;  %v432_v7 = vmul.f32 %v383_v56, %v1241_v22  ;;  %v433_v17 = vmul.f32 %v387_v63, %v1241_v22 }
  0xdd   : > { %v1263_v43 = vadd.f32 %v426_v28, %v335_v24  ;;  %v1265_v44 = vadd.f32 %v427_v29, %v336_v25  ;;  %v1285_v58 = vadd.f32 %v428_v42, %v337_v38  ;;  %v1295_v1 = vadd.f32 %v429_v50, %v338_v48  ;;  %v227_v25 = vld [vmem:[%s1200_s6 + $0x50] sm:$0xff]  ;;  %v229_v48 = vld [vmem:[%s1200_s6 + $0x60] sm:$0xff] }
  0xde   : > { %v444_v8 = vadd.f32 %v430_v57, %v339_v54  ;;  %v445_v18 = vadd.f32 %v431_v0, %v340_v61  ;;  %v343_v24 = vadd.f32 %v300_v3, %v225_v5  ;;  %v399_v26 = vrot.slane %v1277_v52, %v1223_v12  ;;  %v230_v57 = vld [vmem:[%s1200_s6 + $0x68] sm:$0xff] }
  0xdf   : > { %v454_v59 = vadd.f32 %v1265_v44, %v1263_v43  ;;  %v434_v28 = vmul.f32 %v391_v6, %v1241_v22  ;;  %v446_v29 = vadd.f32 %v432_v7, %v341_v4  ;;  %v435_v36 = vmul.f32 %v395_v16, %v1241_v22 }
  0xe0   : > { %v447_v37 = vadd.f32 %v433_v17, %v342_v14  ;;  %v345_v40 = vadd.f32 %v308_v23, %v227_v25  ;;  %v407_v41 = vrot.slane %v1277_v52, %v1239_v21  ;;  %v436_v42 = vmul.f32 %v399_v26, %v1241_v22 }
  0xe1   : > { %v455_v2 = vadd.f32 %v454_v59, %v1285_v58  ;;  %v448_v45 = vadd.f32 %v434_v28, %v343_v24  ;;  %v320_v49 = vrot.slane %v1275_v51, %v1246_v27  ;;  %v346_v50 = vadd.f32 %v312_v31, %v228_v34 }
  0xe2   : > { %v437_v54 = vmul.f32 %v403_v35, %v1241_v22  ;;  %v449_v55 = vadd.f32 %v435_v36, %v344_v32  ;;  %v347_v59 = vadd.f32 %v316_v39, %v229_v48  ;;  %v438_v60 = vmul.f32 %v407_v41, %v1241_v22 }
  0xe3   : > { %v456_v11 = vadd.f32 %v455_v2, %v1295_v1  ;;  %v450_v61 = vadd.f32 %v436_v42, %v345_v40  ;;  %v348_v63 = vadd.f32 %v320_v49, %v230_v57  ;;  %v439_v0 = vmul.f32 %v411_v53, %v1241_v22 }
  0xe4   : > { %v451_v2 = vadd.f32 %v437_v54, %v346_v50  ;;  %v452_v51 = vadd.f32 %v438_v60, %v347_v59  ;;  %v248_v60 = vld [vmem:[#allocation5 + $0x2] ss:$8 sm:$0xf] }
  0xe5   : > { %v457_v20 = vadd.f32 %v456_v11, %v444_v8  ;;  %v453_v5 = vadd.f32 %v439_v0, %v348_v63  ;;  %v252_v63 = vld [vmem:[#allocation5 + $0x42] ss:$8 sm:$0xf] }
  0xe6   : > { %v253_v0 = vld [vmem:[#allocation5 + $0x42] ss:$8 sm:$0x30] }
  0xe7   : > { %v458_v30 = vadd.f32 %v457_v20, %v445_v18 }
  0xe9   : > { %v459_v38 = vadd.f32 %v458_v30, %v446_v29 }
  0xeb   : > { %v460_v47 = vadd.f32 %v459_v38, %v447_v37 }
  0xed   : > { %v461_v56 = vadd.f32 %v460_v47, %v448_v45 }
  0xef   : > { %v462_v62 = vadd.f32 %v461_v56, %v449_v55 }
  0xf1   : > { %v463_v3 = vadd.f32 %v462_v62, %v450_v61  ;;  %v249_v62 = vld [vmem:[#allocation5 + $0x2] ss:$8 sm:$0xf0] }
  0xf3   : > { %v464_v4 = vadd.f32 %v463_v3, %v451_v2  ;;  %v256_v3 = vld [vmem:[#allocation5 + $0x3] ss:$8 sm:$0xf] }
  0xf5   : > { %v465_v6 = vadd.f32 %v464_v4, %v452_v51  ;;  %v250_v4 = vor.u32 %v249_v62, %v248_v60 }
  0xf7   : > { %v466_v52 = vadd.f32 %v465_v6, %v453_v5  ;;  %v261_v6 = vld [vmem:[#allocation5 + $0x43] ss:$8 sm:$0x30] }
  0xf9   : > { %467 = vadd.xlane.f32.xlu0 %v466_v52  ;;  %v254_v52 = vor.u32 %v253_v0, %v252_v63 }
 0x186   : > { %v468_v7 = vpop.xlane.xlu0 %467 }
 0x187   : > { %v469_v11 = vmul.f32 0.00055803574, %v468_v7 }
 0x189   : > { %v1338_v13 = vsub.f32 %v1263_v43, %v469_v11  ;;  %v1341_v14 = vsub.f32 %v1265_v44, %v469_v11  ;;  %v1344_v15 = vsub.f32 %v1285_v58, %v469_v11  ;;  %v1351_v17 = vsub.f32 %v1295_v1, %v469_v11 }
 0x18a   : > { %v1353_v20 = vsub.f32 %v444_v8, %v469_v11  ;;  %v1357_v44 = vsub.f32 %v445_v18, %v469_v11  ;;  %v1361_v25 = vsub.f32 %v446_v29, %v469_v11  ;;  %v1365_v1 = vsub.f32 %v447_v37, %v469_v11 }
 0x18b   : > { %v484_v22 = vmul.f32 %v1338_v13, %v1338_v13  ;;  %v485_v16 = vmul.f32 %v1341_v14, %v1341_v14  ;;  %v486_v43 = vmul.f32 %v1344_v15, %v1344_v15  ;;  %v487_v58 = vmul.f32 %v1351_v17, %v1351_v17 }
 0x18c   : > { %v488_v26 = vmul.f32 %v1353_v20, %v1353_v20  ;;  %v489_v8 = vmul.f32 %v1357_v44, %v1357_v44  ;;  %v1369_v31 = vsub.f32 %v448_v45, %v469_v11  ;;  %v490_v18 = vmul.f32 %v1361_v25, %v1361_v25 }
 0x18d   : > { %v498_v23 = vadd.f32 %v485_v16, %v484_v22  ;;  %v1373_v34 = vsub.f32 %v449_v55, %v469_v11  ;;  %v491_v29 = vmul.f32 %v1365_v1, %v1365_v1  ;;  %v1377_v36 = vsub.f32 %v450_v61, %v469_v11 }
 0x18e   : > { %v492_v37 = vmul.f32 %v1369_v31, %v1369_v31  ;;  %v1381_v39 = vsub.f32 %v451_v2, %v469_v11  ;;  %v1385_v42 = vsub.f32 %v452_v51, %v469_v11  ;;  %v1389_v48 = vsub.f32 %v453_v5, %v469_v11  ;;  %v257_v51 = vld [vmem:[#allocation5 + $0x3] ss:$8 sm:$0xf0] }
 0x18f   : > { %v499_v24 = vadd.f32 %v498_v23, %v486_v43  ;;  %v493_v40 = vmul.f32 %v1373_v34, %v1373_v34  ;;  %v494_v45 = vmul.f32 %v1377_v36, %v1377_v36  ;;  %v260_v5 = vld [vmem:[#allocation5 + $0x43] ss:$8 sm:$0xf]  ;;  %v1397_v7 = vor.u32 %v257_v51, %v256_v3 }
 0x190   : > { %v495_v49 = vmul.f32 %v1381_v39, %v1381_v39  ;;  %v496_v53 = vmul.f32 %v1385_v42, %v1385_v42  ;;  %v497_v55 = vmul.f32 %v1389_v48, %v1389_v48  ;;  %v1399_v11 = vor.u32 %v261_v6, %v260_v5 }
 0x191   : > { %v500_v28 = vadd.f32 %v499_v24, %v487_v58  ;;  %v535_v22 = vrot.slane %v250_v4, %v1217_v9  ;;  %v539_v16 = vrot.slane %v250_v4, %v1219_v10  ;;  %v543_v43 = vrot.slane %v250_v4, %v1223_v12 }
 0x192   : > { %v547_v23 = vrot.slane %v250_v4, %v1235_v19  ;;  %v551_v58 = vrot.slane %v250_v4, %v1239_v21  ;;  %v555_v24 = vrot.slane %v250_v4, %v1246_v27 }
 0x193   : > { %v501_v30 = vadd.f32 %v500_v28, %v488_v26  ;;  %v559_v26 = vrot.slane %v250_v4, %v1254_v33  ;;  %v563_v28 = vrot.slane %v250_v4, %v1269_v46 }
 0x195   : > { %v502_v32 = vadd.f32 %v501_v30, %v489_v8  ;;  %v567_v8 = vrot.slane %v254_v52, %v1217_v9  ;;  %v571_v30 = vrot.slane %v254_v52, %v1219_v10 }
 0x197   : > { %v503_v35 = vadd.f32 %v502_v32, %v490_v18  ;;  %v575_v18 = vrot.slane %v254_v52, %v1223_v12  ;;  %v579_v32 = vrot.slane %v254_v52, %v1235_v19 }
 0x199   : > { %v504_v38 = vadd.f32 %v503_v35, %v491_v29  ;;  %v583_v29 = vrot.slane %v254_v52, %v1239_v21  ;;  %v587_v35 = vrot.slane %v254_v52, %v1246_v27 }
 0x19b   : > { %v505_v41 = vadd.f32 %v504_v38, %v492_v37  ;;  %v621_v37 = vrot.slane %v1397_v7, %v1217_v9  ;;  %v625_v38 = vrot.slane %v1397_v7, %v1219_v10 }
 0x19d   : > { %v506_v47 = vadd.f32 %v505_v41, %v493_v40  ;;  %v629_v40 = vrot.slane %v1397_v7, %v1223_v12  ;;  %v633_v41 = vrot.slane %v1397_v7, %v1235_v19 }
 0x19f   : > { %v507_v50 = vadd.f32 %v506_v47, %v494_v45  ;;  %v637_v45 = vrot.slane %v1397_v7, %v1239_v21  ;;  %v641_v47 = vrot.slane %v1397_v7, %v1246_v27 }
 0x1a1   : > { %v508_v54 = vadd.f32 %v507_v50, %v495_v49  ;;  %v645_v49 = vrot.slane %v1397_v7, %v1254_v33  ;;  %v649_v50 = vrot.slane %v1397_v7, %v1269_v46  ;;  %v673_v33 = vrot.slane %v1399_v11, %v1246_v27 }
 0x1a3   : > { %v509_v56 = vadd.f32 %v508_v54, %v496_v53  ;;  %v653_v53 = vrot.slane %v1399_v11, %v1217_v9  ;;  %v657_v54 = vrot.slane %v1399_v11, %v1219_v10 }
 0x1a5   : > { %v510_v57 = vadd.f32 %v509_v56, %v497_v55  ;;  %v661_v56 = vrot.slane %v1399_v11, %v1223_v12 }
 0x1a7   : > { %511 = vadd.xlane.f32.xlu1 %v510_v57  ;;  %v665_v57 = vrot.slane %v1399_v11, %v1235_v19 }
 0x234   : > { %v512_v59 = vpop.xlane.xlu1 %511 }
 0x235   : > { %v513_v61 = vmul.f32 0.00055803574, %v512_v59  ;;  %v669_v59 = vrot.slane %v1399_v11, %v1239_v21 }
 0x237   : > { %v514_v2 = vadd.f32 1e-05, %v513_v61 }
 0x239   : > { %897 = vrsqrt.f32 %v514_v2 }
 0x243   : > { %v898_v55 = vpop.eup %897 }
 0x244   : > { %v516_v46 = vmul.f32 %v898_v55, %v1338_v13  ;;  %v517_v9 = vmul.f32 %v898_v55, %v1341_v14  ;;  %v518_v60 = vmul.f32 %v898_v55, %v1344_v15  ;;  %v519_v10 = vmul.f32 %v898_v55, %v1351_v17 }
 0x245   : > { %v520_v61 = vmul.f32 %v898_v55, %v1353_v20  ;;  %v521_v12 = vmul.f32 %v898_v55, %v1357_v44  ;;  %v522_v19 = vmul.f32 %v898_v55, %v1361_v25  ;;  %v523_v62 = vmul.f32 %v898_v55, %v1365_v1 }
 0x246   : > { %v524_v21 = vmul.f32 %v898_v55, %v1369_v31  ;;  %v525_v27 = vmul.f32 %v898_v55, %v1373_v34  ;;  %v526_v13 = vmul.f32 %v898_v55, %v1377_v36  ;;  %v527_v14 = vmul.f32 %v898_v55, %v1381_v39 }
 0x247   : > { %v528_v15 = vmul.f32 %v898_v55, %v1385_v42  ;;  %v529_v17 = vmul.f32 %v898_v55, %v1389_v48  ;;  %v602_v20 = vmul.f32 %v535_v22, %v516_v46  ;;  %v603_v63 = vmul.f32 %v539_v16, %v517_v9 }
 0x248   : > { %v604_v44 = vmul.f32 %v543_v43, %v518_v60  ;;  %v605_v0 = vmul.f32 %v547_v23, %v519_v10  ;;  %v606_v25 = vmul.f32 %v551_v58, %v520_v61  ;;  %v607_v1 = vmul.f32 %v555_v24, %v521_v12 }
 0x249   : > { %v608_v2 = vmul.f32 %v559_v26, %v522_v19  ;;  %v609_v31 = vmul.f32 %v563_v28, %v523_v62  ;;  %v610_v3 = vmul.f32 %v567_v8, %v524_v21  ;;  %v611_v34 = vmul.f32 %v571_v30, %v525_v27 }
 0x24a   : > { %v612_v51 = vmul.f32 %v575_v18, %v526_v13  ;;  %v613_v36 = vmul.f32 %v579_v32, %v527_v14  ;;  %v614_v4 = vmul.f32 %v583_v29, %v528_v15  ;;  %v615_v39 = vmul.f32 %v587_v35, %v529_v17 }
 0x24b   : > { %v688_v42 = vadd.f32 %v621_v37, %v602_v20  ;;  %v689_v5 = vadd.f32 %v625_v38, %v603_v63  ;;  %v690_v6 = vadd.f32 %v629_v40, %v604_v44  ;;  %v691_v48 = vadd.f32 %v633_v41, %v605_v0 }
 0x24c   : > { %v692_v52 = vadd.f32 %v637_v45, %v606_v25  ;;  %v693_v7 = vadd.f32 %v641_v47, %v607_v1  ;;  %v694_v11 = vadd.f32 %v645_v49, %v608_v2  ;;  %v695_v22 = vadd.f32 %v649_v50, %v609_v31 }
 0x24d   : > { %v696_v16 = vadd.f32 %v653_v53, %v610_v3  ;;  %v697_v43 = vadd.f32 %v657_v54, %v611_v34  ;;  %v698_v23 = vadd.f32 %v661_v56, %v612_v51  ;;  %v699_v58 = vadd.f32 %v665_v57, %v613_v36  ;;  %702 = vst [vmem:[%s212_s7] sm:$0xff] %v688_v42 }
 0x24e   : > { %703 = vst [vmem:[%s212_s7 + $0x8] sm:$0xff] %v689_v5  ;;  %704 = vst [vmem:[%s212_s7 + $0x10] sm:$0xff] %v690_v6  ;;  %v700_v24 = vadd.f32 %v669_v59, %v614_v4  ;;  %v701_v26 = vadd.f32 %v673_v33, %v615_v39 }
 0x24f   : > { %705 = vst [vmem:[%s212_s7 + $0x18] sm:$0xff] %v691_v48  ;;  %706 = vst [vmem:[%s212_s7 + $0x20] sm:$0xff] %v692_v52 }
 0x250   : > { %707 = vst [vmem:[%s212_s7 + $0x28] sm:$0xff] %v693_v7  ;;  %708 = vst [vmem:[%s212_s7 + $0x30] sm:$0xff] %v694_v11 }
 0x251   : > { %709 = vst [vmem:[%s212_s7 + $0x38] sm:$0xff] %v695_v22  ;;  %710 = vst [vmem:[%s212_s7 + $0x40] sm:$0xff] %v696_v16 }
 0x252   : > { %711 = vst [vmem:[%s212_s7 + $0x48] sm:$0xff] %v697_v43  ;;  %712 = vst [vmem:[%s212_s7 + $0x50] sm:$0xff] %v698_v23 }
 0x253   : > { %713 = vst [vmem:[%s212_s7 + $0x58] sm:$0xff] %v699_v58  ;;  %714 = vst [vmem:[%s212_s7 + $0x60] sm:$0xff] %v700_v24 }
 0x254   : > { %715 = vst [vmem:[%s212_s7 + $0x68] sm:$0xff] %v701_v26 }
 0x255   : > { %970 = shalt.err (!%p967_p1)
}
 0x256   : > { %s971_s26 = scalar_lea.hbm %s1463_s10, 1792  ;;  %s975_s20 = scalar_lea.hbm %s1510_s3, 3584 }
 0x257   : > { %p972_p2 = scmp.ne.s32.totalorder %s1463_s10, %s971_s26  ;;  %p976_p0 = scmp.lt.u32.totalorder %s1463_s10, %s1510_s3 }
 0x258   : > { %p977_p4 = scmp.lt.u32.totalorder %s975_s20, %s971_s26  ;;  %p979_p9 = scmp.lt.u32.totalorder %s971_s26, %s1463_s10 }
 0x259   : > { %p973_p7 = pnand %p972_p2, %p1145_p8 }
 0x25a   : > { %p978_p6 = por %p977_p4, %p976_p0 }
 0x25b   : > { %p974_p3 = pneg %p973_p7 }
 0x25c   : > { %p980_p12 = por %p979_p9, %p978_p6 }
 0x25e   : > { %p981_p13 = pnand %p980_p12, %p974_p3 }
 0x260   : > { %984 = shalt.err (!%p981_p13)
}
 0x261   : > { %844 = dma.vmem_to_hbm [thread:$0]  (%p1145_p8), %s1465_s8, 1792, %s1463_s10, %s717_s21  }
 0x262 PF: > { %s743_s30 = sand.u32 1, %s1015_s12   ;;  %p1529_p11 = scmp.ne.s32.totalorder %s1515_s19, 0 }
 0x263   : > { %p1530_p5 = scmp.ge.s32.totalorder %s1027_s15, 2  ;;  %s744_s4 = scalar_lea.sflag [#allocation4], %s743_s30 }
 0x265   : > { %p855_p10 = pnand %p1530_p5, %p1529_p11 }
 0x267   : > { %1010 = dma.done.wait (!%p855_p10), %s744_s4, 1792  }
 0x268   : > { %1012 = vsyncadd (!%p855_p10), %s744_s4, 4294965504  ;;  %p17_p1 = scmp.ge.s32.totalorder %s1101_s23, 4   ;;  %s1531_s12 = smov %s1019_s13 }
 0x269   : > { %s1532_s13 = smov %s1023_s14  ;;  %s1533_s14 = smov %s1137_s11 }
 0x26a   : > { %s1534_s15 = smov %s1101_s23  ;;  %19 = sbr.rel (!%p17_p1) target bundleno = 6 (0x6), region = 91 }
 0x271   :  { %749 = vsyncpa [#allocation3], 1 }
 0x272   :  { %751 = vsyncpa [#allocation3 + $0x1], 1 }
 0x273   :  { %752 = vsyncpa [#allocation6], 1 }
 0x274   :  { %753 = vsyncpa [#allocation4], 1 }
 0x275   :  { %755 = vsyncpa [#allocation4 + $0x1], 1 }

</bundles_post_ra>
